<compile_context>
chip_gen: v6e
topology: v6e:2x2x1
jax: 0.10.0
libtpu: 0.0.40
codegen_flags: <defaults>
</compile_context>

<pallas_src>
import functools
import math

import jax
import jax.numpy as jnp
import numpy as np
from jax.experimental import pallas as pl
from jax.experimental.pallas import tpu as pltpu


def build_pe_table(max_seq_len: int, dim: int) -> jnp.ndarray:
    """Sin/cos table [max_seq_len, dim], mirroring the PyTorch __init__ exactly
    (computed in float64 on host, stored float32)."""
    assert dim % 2 == 0, "PositionalEmbedding requires an even d_model"
    pos = np.arange(max_seq_len, dtype=np.float64)[:, None]                  # [L, 1]
    div_term = np.exp(np.arange(0, dim, 2, dtype=np.float64)
                      * -(math.log(10000.0) / dim))                          # [D/2]
    angles = pos / div_term                                                  # [L, D/2]
    pe = np.zeros((max_seq_len, dim), dtype=np.float32)
    pe[:, 0::2] = np.sin(angles)
    pe[:, 1::2] = np.cos(angles)
    return jnp.asarray(pe)                                                   # [L, D]


# --------------------------------------------------------------------------- #
# Kernels
# --------------------------------------------------------------------------- #
def _add_pe_full_kernel(embd_ref, pe_ref, o_ref, *, inv_sqrt_dim):
    # embd_ref/o_ref: (rows, lanes).  pe_ref: (rows, lanes) or (1, lanes);
    # the (1, lanes) case broadcasts across sublanes ONCE per tile.
    # Single unmasked full-slab store.
    o_ref[...] = embd_ref[...] * inv_sqrt_dim + pe_ref[...]


def _add_pe_batched_kernel(embd_ref, pe_ref, o_ref, *, inv_sqrt_dim,
                           n_batch, d_model):
    # embd_ref/o_ref: (TS, B*D) lane-dense slab;  pe_ref: (TS, D).
    # Only used when d_model % 128 == 0, so every per-batch slice is a
    # lane-aligned, unmasked D-wide store and pe needs no broadcast at all.
    pe = pe_ref[...]
    for b in range(n_batch):                      # static unroll (small n_batch)
        sl = slice(b * d_model, (b + 1) * d_model)
        o_ref[:, sl] = embd_ref[:, sl] * inv_sqrt_dim + pe


# --------------------------------------------------------------------------- #
# Tiling / VMEM policy
# --------------------------------------------------------------------------- #
def _vmem_params():
    """(per-operand tile budget, scoped vmem limit, min grid steps), per chip."""
    cap = 128 * 1024 * 1024
    try:
        cap = int(getattr(pltpu.get_tpu_info(), "vmem_capacity_bytes", cap))
    except Exception:
        pass
    if cap <= 64 * 1024 * 1024:
        # v7x-class: 64 MiB physical VMEM per TensorCore, 3.2 TB/s HBM.
        return 8 * 1024 * 1024, 48 * 1024 * 1024, 8
    # v5e / v6e: 128 MiB physical VMEM.
    return 8 * 1024 * 1024, 64 * 1024 * 1024, 4


def _choose_row_tile(n_rows: int, row_bytes: int, itemsize: int,
                     budget_bytes: int, min_tiles: int) -> int:
    """Row tile that (a) keeps one slab under budget_bytes, (b) leaves at least
    `min_tiles` grid steps when the row count allows it (DMA/compute overlap,
    both v7x TCs busy), and (c) is a multiple of the packed sublane count for
    this dtype (8 rows f32 / 16 bf16 / 32 int8)."""
    sub = max(8, 32 // max(1, itemsize))
    ts = max(1, budget_bytes // max(1, row_bytes))
    ts = min(ts, max(sub, -(-n_rows // min_tiles)))   # enforce >= min_tiles steps
    if ts >= n_rows:
        return n_rows                                  # full extent always legal
    return max(sub, (ts // sub) * sub)


def _run(kernel, embd2, pe_in, embd_spec, pe_spec, out_spec, grid,
         vmem_limit, flops, bytes_accessed):
    return pl.pallas_call(
        kernel,
        out_shape=jax.ShapeDtypeStruct(embd2.shape, embd2.dtype),
        grid_spec=pltpu.PrefetchScalarGridSpec(
            num_scalar_prefetch=0,
            grid=grid,
            in_specs=[embd_spec, pe_spec],
            out_specs=out_spec,
        ),
        compiler_params=pltpu.CompilerParams(
            dimension_semantics=("parallel",),     # v7x: shard row tiles over 2 TCs
            vmem_limit_bytes=vmem_limit,
        ),
        cost_estimate=pl.CostEstimate(
            flops=flops, transcendentals=0, bytes_accessed=bytes_accessed),
    )(embd2, pe_in)


# --------------------------------------------------------------------------- #
# Forward
# --------------------------------------------------------------------------- #
def positional_embedding_forward(embd: jnp.ndarray, pe_table: jnp.ndarray,
                                 dim: int, step=None) -> jnp.ndarray:
    """embd: [seq_len, n_batch, d_model] -> same shape (eval-mode dropout)."""
    seq_len, n_batch, d_model = embd.shape
    assert d_model == dim
    dtype = embd.dtype
    itemsize = jnp.dtype(dtype).itemsize
    inv_sqrt_dim = 1.0 / math.sqrt(dim)
    budget, vmem_limit, min_tiles = _vmem_params()

    # pe: cast once to embd's dtype (halves pe traffic for bf16 activations).
    pe_cast = pe_table.astype(dtype)

    if step is not None:
        # ---------------- decode / step path: [S*B, D] slab ---------------- #
        rows = seq_len * n_batch
        embd2 = embd.reshape(rows, d_model)                 # contiguous view
        # Single row pe[step]: tiny dynamic_slice, no [S,1,D] broadcast.
        pe_in = jax.lax.dynamic_slice_in_dim(pe_cast, step, 1, axis=0)  # (1, D)
        tr = _choose_row_tile(rows, d_model * itemsize, itemsize, budget, min_tiles)
        grid = (pl.cdiv(rows, tr),)

        kernel = functools.partial(_add_pe_full_kernel, inv_sqrt_dim=inv_sqrt_dim)
        embd_spec = pl.BlockSpec((tr, d_model), lambda i: (i, 0))
        pe_spec = pl.BlockSpec((1, d_model), lambda i: (0, 0))
        out_spec = pl.BlockSpec((tr, d_model), lambda i: (i, 0))

        out2 = _run(kernel, embd2, pe_in, embd_spec, pe_spec, out_spec, grid,
                    vmem_limit,
                    flops=2 * rows * d_model,
                    bytes_accessed=2 * rows * d_model * itemsize
                                   + d_model * itemsize)
        return out2.reshape(seq_len, n_batch, d_model)

    # ------------------- sequence path: [S, B*D] slab ---------------------- #
    lanes = n_batch * d_model
    embd2 = embd.reshape(seq_len, lanes)                    # contiguous view
    ts = _choose_row_tile(seq_len, lanes * itemsize, itemsize, budget, min_tiles)
    grid = (pl.cdiv(seq_len, ts),)

    embd_spec = pl.BlockSpec((ts, lanes), lambda i: (i, 0))
    out_spec = pl.BlockSpec((ts, lanes), lambda i: (i, 0))

    if d_model % 128 == 0:
        # Narrow pe (TS, D); per-batch slices are lane-aligned unmasked stores.
        pe_in = pe_cast[:seq_len]                                        # (S, D)
        pe_spec = pl.BlockSpec((ts, d_model), lambda i: (i, 0))
        kernel = functools.partial(_add_pe_batched_kernel,
                                   inv_sqrt_dim=inv_sqrt_dim,
                                   n_batch=n_batch, d_model=d_model)
        bytes_accessed = 2 * seq_len * lanes * itemsize \
                         + seq_len * d_model * itemsize
    else:
        # d_model not lane-aligned: pre-tile pe to the slab width so the kernel
        # issues one unmasked full-slab store (no masked vst / lane rotations).
        pe_in = jnp.tile(pe_cast[:seq_len], (1, n_batch))                # (S, B*D)
        pe_spec = pl.BlockSpec((ts, lanes), lambda i: (i, 0))
        kernel = functools.partial(_add_pe_full_kernel, inv_sqrt_dim=inv_sqrt_dim)
        bytes_accessed = 3 * seq_len * lanes * itemsize

    out2 = _run(kernel, embd2, pe_in, embd_spec, pe_spec, out_spec, grid,
                vmem_limit,
                flops=2 * seq_len * lanes,
                bytes_accessed=bytes_accessed)
    return out2.reshape(seq_len, n_batch, d_model)


# --------------------------------------------------------------------------- #
# Demo / correctness check
# --------------------------------------------------------------------------- #
if __name__ == "__main__":
    key = jax.random.PRNGKey(0)

    # Case 1: d_model = 32 (not lane-aligned -> full-slab fallback path).
    max_seq_len, dim, seq_len, n_batch = 16, 32, 8, 2
    pe_table = build_pe_table(max_seq_len, dim)                          # [16, 32]
    k1, k2 = jax.random.split(key)
    embd = jax.random.normal(k1, (seq_len, n_batch, dim), dtype=jnp.float32)

    out = jax.block_until_ready(
        positional_embedding_forward(embd, pe_table, dim, step=None))
    ref = embd / math.sqrt(dim) + pe_table[:seq_len][:, None, :]
    assert out.shape == (seq_len, n_batch, dim)
    assert jnp.allclose(out, ref, atol=1e-5, rtol=1e-5)

    # Decode path (step=3): [S*B, D] slab, single broadcast + full-width store.
    step = 3
    out_s = jax.block_until_ready(
        positional_embedding_forward(embd, pe_table, dim, step=step))
    ref_s = embd / math.sqrt(dim) + pe_table[step][None, None, :]
    assert jnp.allclose(out_s, ref_s, atol=1e-5, rtol=1e-5)

    # Case 2: d_model = 128 (lane-aligned -> narrow-pe batched path).
    dim2 = 128
    pe_table2 = build_pe_table(max_seq_len, dim2)                        # [16, 128]
    embd2 = jax.random.normal(k2, (seq_len, n_batch, dim2), dtype=jnp.float32)
    out2 = jax.block_until_ready(
        positional_embedding_forward(embd2, pe_table2, dim2, step=None))
    ref2 = embd2 / math.sqrt(dim2) + pe_table2[:seq_len][:, None, :]
    assert jnp.allclose(out2, ref2, atol=1e-5, rtol=1e-5)

    print("KERNEL_OK")
</pallas_src>

<mosaic_0001>
module attributes {stable_mosaic.version = 11 : i64} {
  func.func @_add_pe_full_kernel(%arg0: i32, %arg1: memref<8x64xf32, #tpu.memory_space<vmem>>, %arg2: memref<8x64xf32, #tpu.memory_space<vmem>>, %arg3: memref<8x64xf32, #tpu.memory_space<vmem>>) attributes {dimension_semantics = [#tpu.dimension_semantics<parallel>], iteration_bounds = array<i64: 1>, scalar_prefetch = 0 : i64, scratch_operands = 0 : i64, tpu.core_type = #tpu.core_type<tc>, window_params = [{transform_indices = @transform_0, window_bounds = array<i64: 8, 64>}, {transform_indices = @transform_1, window_bounds = array<i64: 8, 64>}, {transform_indices = @transform_2, window_bounds = array<i64: 8, 64>}]} {
    %c0 = arith.constant 0 : index
    %c0_0 = arith.constant 0 : index
    %0 = vector.load %arg1[%c0, %c0_0] : memref<8x64xf32, #tpu.memory_space<vmem>>, vector<8x64xf32>
    %cst = arith.constant 0.176776692 : f32
    %1 = vector.broadcast %cst : f32 to vector<8x64xf32>
    %2 = arith.mulf %0, %1 : vector<8x64xf32>
    %c0_1 = arith.constant 0 : index
    %c0_2 = arith.constant 0 : index
    %3 = vector.load %arg2[%c0_1, %c0_2] : memref<8x64xf32, #tpu.memory_space<vmem>>, vector<8x64xf32>
    %4 = arith.addf %2, %3 : vector<8x64xf32>
    %c0_3 = arith.constant 0 : index
    %c0_4 = arith.constant 0 : index
    %5 = vector.load %arg3[%c0_3, %c0_4] : memref<8x64xf32, #tpu.memory_space<vmem>>, vector<8x64xf32>
    tpu.vector_store %arg3[%c0_3, %c0_4], %4 {strides = array<i32>} : memref<8x64xf32, #tpu.memory_space<vmem>>, vector<8x64xf32>,
    return
  }
  func.func @transform_0(%arg0: i32) -> (i32, i32) {
    %c0_i32 = arith.constant 0 : i32
    %c0_i32_0 = arith.constant 0 : i32
    return %arg0, %c0_i32 : i32, i32
  }
  func.func @transform_1(%arg0: i32) -> (i32, i32) {
    %c0_i32 = arith.constant 0 : i32
    %c0_i32_0 = arith.constant 0 : i32
    return %arg0, %c0_i32 : i32, i32
  }
  func.func @transform_2(%arg0: i32) -> (i32, i32) {
    %c0_i32 = arith.constant 0 : i32
    %c0_i32_0 = arith.constant 0 : i32
    return %arg0, %c0_i32 : i32, i32
  }
}

</mosaic_0001>

<bundles_post_ra>
// kernel: tpu_custom_call.1
= control target key start
LH: loop header
LB: loop body
LE: loop exit
PB: predicated region body
PF: predicated region fallthrough
CT: control target
= control target key end

     0   :  { %7 = vsyncpa [#allocation3], 0  ;;  %s154_s0 = inlined_call_operand.hbm [shape: f32[8,64], index: 0, kind: input, shape index: {}]   ;;  %s155_s1 = inlined_call_operand.hbm [shape: f32[8,64], index: 1, kind: input, shape index: {}]   ;;  %s156_s2 = inlined_call_operand.hbm [shape: f32[8,64], index: 2, kind: output, shape index: {}]  }
   0x1   :  { %8 = vsyncpa [#allocation6], 0 }
   0x2   :  { %9 = vsyncpa [#allocation4], 0  ;;  %s127_s9 = smov [#allocation2]   ;;  %s128_s11 = smov [#allocation5]  }
   0x3   :  { %s16_s10 = sshll.u32 %s127_s9, 4  ;;  %s26_s12 = sshll.u32 %s128_s11, 4  ;;  %s17_s10 = int_to_ptr.vmem [resolvable:$true] %s16_s10  ;;  %s27_s12 = int_to_ptr.vmem [resolvable:$true] %s26_s12 }
   0x4   :  { %s69_s13 = scalar_lea.vmem %s17_s10, 128  ;;  %p74_p1 = scmp.lt.s32.totalorder %s17_s10, %s17_s10 }
   0x5   :  { %p70_p0 = scmp.ne.s32.totalorder %s17_s10, %s69_s13  ;;  %p75_p2 = scmp.lt.s32.totalorder %s69_s13, %s69_s13 }
   0x7   :  { %p76_p3 = por %p75_p2, %p74_p1 }
   0x9   :  { %p77_p4 = pnand %p76_p3, %p70_p0 }
   0xb   :  { %80 = shalt.err (!%p77_p4)
}
   0xc   :  { %19 = dma.hbm_to_vmem [thread:$0]  %s154_s0, 128, %s17_s10, [#allocation3]  }
   0xd   :  { %s89_s16 = scalar_lea.vmem %s27_s12, 128  ;;  %p94_p6 = scmp.lt.s32.totalorder %s27_s12, %s27_s12 }
   0xe   :  { %p90_p5 = scmp.ne.s32.totalorder %s27_s12, %s89_s16  ;;  %p95_p7 = scmp.lt.s32.totalorder %s89_s16, %s89_s16 }
  0x10   :  { %p96_p8 = por %p95_p7, %p94_p6 }
  0x12   :  { %p97_p9 = pnand %p96_p8, %p90_p5 }
  0x14   :  { %100 = shalt.err (!%p97_p9)
}
  0x15   :  { %29 = dma.hbm_to_vmem [thread:$0]  %s155_s1, 128, %s27_s12, [#allocation6]  }
  0x16   :  { %121 = dma.done.wait [#allocation3], 128  }
  0x17   :  { %122 = vsyncadd [#allocation3], 4294967168 }
  0x18   :  { %123 = dma.done.wait [#allocation6], 128  }
  0x19   :  { %124 = vsyncadd [#allocation6], 4294967168  ;;  %v36_v0 = vld [vmem:[#allocation2] sm:$0xff]  ;;  %v38_v1 = vld [vmem:[#allocation5] sm:$0xff]  ;;  %s129_s19 = smov [#allocation7]   ;;  %vm40_vm0 = vcmask 523264  }
  0x1a   :  { %s48_s20 = sshll.u32 %s129_s19, 4  ;;  %v37_v2 = vmul.f32 0.17677669, %v36_v0  ;;  %s49_s20 = int_to_ptr.vmem [resolvable:$true] %s48_s20 }
  0x1b   :  { %s101_s0 = scalar_lea.vmem %s49_s20, 128  ;;  %p106_p11 = scmp.lt.s32.totalorder %s49_s20, %s49_s20 }
  0x1c   :  { %v39_v3 = vadd.f32 %v38_v1, %v37_v2  ;;  %p102_p10 = scmp.ne.s32.totalorder %s49_s20, %s101_s0  ;;  %p107_p12 = scmp.lt.s32.totalorder %s101_s0, %s101_s0 }
  0x1e   :  { %41 = vst.msk [vmem:[#allocation7] sm:$0xff] %vm40_vm0, %v39_v3  ;;  %p108_p13 = por %p107_p12, %p106_p11 }
  0x20   :  { %p109_p0 = pnand %p108_p13, %p102_p10 }
  0x22   :  { %112 = shalt.err (!%p109_p0)
}
  0x23   :  { %51 = dma.vmem_to_hbm [thread:$0]  %s49_s20, 128, %s156_s2, [#allocation4]  }
  0x24   :  { %125 = dma.done.wait [#allocation4], 128  }
  0x25   :  { %126 = vsyncadd [#allocation4], 4294967168 }
  0x26   :  { %55 = vsyncpa [#allocation3], 1 }
  0x27   :  { %56 = vsyncpa [#allocation6], 1 }
  0x28   :  { %57 = vsyncpa [#allocation4], 1 }

</bundles_post_ra>
